<compile_context>
chip_gen: v7x
topology: tpu7x:2x2x1
jax: 0.10.0
libtpu: 0.0.40
codegen_flags: <defaults>
</compile_context>

<pallas_src>
import functools
import math

import jax
import jax.numpy as jnp
from jax.experimental import pallas as pl
from jax.experimental.pallas import tpu as pltpu


def _round_up(x: int, m: int) -> int:
    return (x + m - 1) // m * m


def _pad_seq(x, target_len):
    pad = target_len - x.shape[1]
    if pad:
        x = jnp.pad(x, ((0, 0), (0, pad), (0, 0)))
    return x


# ---------------------------------------------------------------------------
# Kernel 1: fused nn.Linear  y = x @ W.T + b  (W stored [out_features, in_features],
# bf16 operands, f32 accumulate, bias added in f32, bf16 output)
# ---------------------------------------------------------------------------
def _linear_kernel(x_ref, w_ref, b_ref, o_ref):
    y = jax.lax.dot_general(
        x_ref[...], w_ref[...],
        dimension_numbers=(((1,), (1,)), ((), ())),   # contract K with K: no W.T relayout
        preferred_element_type=jnp.float32)
    o_ref[...] = (y + b_ref[...]).astype(o_ref.dtype)


def linear(x2d, w, b, *, tm=256, out_dtype=jnp.bfloat16):
    """x2d: [M, K] bf16, w: [N, K] bf16, b: [N] f32 -> [M, N] bf16."""
    M, K = x2d.shape
    N = w.shape[0]
    tm = min(tm, M)
    grid_m = pl.cdiv(M, tm)
    return pl.pallas_call(
        _linear_kernel,
        out_shape=jax.ShapeDtypeStruct((M, N), out_dtype),
        grid=(grid_m,),
        in_specs=[
            pl.BlockSpec((tm, K), lambda i: (i, 0)),   # streamed activations
            pl.BlockSpec((N, K), lambda i: (0, 0)),    # stacked weight, resident in VMEM
            pl.BlockSpec((1, N), lambda i: (0, 0)),
        ],
        out_specs=pl.BlockSpec((tm, N), lambda i: (i, 0)),
        compiler_params=pltpu.CompilerParams(
            dimension_semantics=("parallel",),
            vmem_limit_bytes=32 * 1024 * 1024),
        cost_estimate=pl.CostEstimate(
            flops=2 * M * K * N,
            transcendentals=0,
            bytes_accessed=2 * (M * K + N * K + M * N) + 4 * N),
    )(x2d, w, b.reshape(1, N).astype(jnp.float32))


# ---------------------------------------------------------------------------
# Kernel 2: entity-aware attention.  One batch element per grid step; all heads
# processed in a static in-kernel loop and packed into one lane-dense store.
#   wq_ref: (1, Swp, 2H)  word-position queries  (lanes [0:H]=vs-word-keys, [H:2H]=vs-entity-keys)
#   eq_ref: (1, Sep, 2H)  entity-position queries (same lane split)
#   kv_ref: (1, Sp,  2H)  lanes [0:H]=K, [H:2H]=V  (Sp = Swp + Sep)
#   o_ref : (1, Sp,  H)   context, heads packed along lanes
# ---------------------------------------------------------------------------
def _ea_attn_kernel(wq_ref, eq_ref, kv_ref, o_ref, *, word_len, ent_len, num_heads):
    Swp = wq_ref.shape[1]
    Sep = eq_ref.shape[1]
    Sp = kv_ref.shape[1]
    H = o_ref.shape[2]
    dh = H // num_heads
    dn = (((1,), (1,)), ((), ()))     # contract head_dim: Q @ K.T without transposing K

    # All-head query slabs for every (word | entity) position.  Swp is a multiple of 16
    # so the sublane concatenation / splits below are bf16-tile aligned (free views).
    qa = jnp.concatenate([wq_ref[0, :, :H], eq_ref[0, :, :H]], axis=0)   # (Sp, H)
    qb = jnp.concatenate([wq_ref[0, :, H:], eq_ref[0, :, H:]], axis=0)   # (Sp, H)
    kw = kv_ref[0, :Swp, :H]      # word keys      (Swp, H)
    ke = kv_ref[0, Swp:, :H]      # entity keys    (Sep, H)
    vw = kv_ref[0, :Swp, H:]      # word values
    ve = kv_ref[0, Swp:, H:]      # entity values

    w_valid = None
    e_valid = None
    if Swp != word_len:           # mask padded word-key columns
        w_valid = jax.lax.broadcasted_iota(jnp.int32, (Sp, Swp), 1) < word_len
    if Sep != ent_len:            # mask padded entity-key columns
        e_valid = jax.lax.broadcasted_iota(jnp.int32, (Sp, Sep), 1) < ent_len

    ctxs = []
    for h in range(num_heads):    # static, unrolled; all slices below are static
        sl = slice(h * dh, (h + 1) * dh)
        s_w = jax.lax.dot_general(qa[:, sl], kw[:, sl], dn,
                                  preferred_element_type=jnp.float32)   # (Sp, Swp)
        s_e = jax.lax.dot_general(qb[:, sl], ke[:, sl], dn,
                                  preferred_element_type=jnp.float32)   # (Sp, Sep)
        if w_valid is not None:
            s_w = jnp.where(w_valid, s_w, -1e30)
        if e_valid is not None:
            s_e = jnp.where(e_valid, s_e, -1e30)
        # Stable softmax over the concatenated [word | entity] key axis, computed
        # without materializing the lane-axis concatenation.  (Scale 1/sqrt(dh) was
        # folded into the query weights in the wrapper.)
        m = jnp.maximum(jnp.max(s_w, axis=-1, keepdims=True),
                        jnp.max(s_e, axis=-1, keepdims=True))
        p_w = jnp.exp(s_w - m)
        p_e = jnp.exp(s_e - m)
        inv = pl.reciprocal(jnp.sum(p_w, axis=-1, keepdims=True)
                            + jnp.sum(p_e, axis=-1, keepdims=True), approx=True)
        ctx = (jnp.dot(p_w.astype(vw.dtype), vw[:, sl], preferred_element_type=jnp.float32)
               + jnp.dot(p_e.astype(ve.dtype), ve[:, sl], preferred_element_type=jnp.float32)
               ) * inv
        ctxs.append(ctx)
    # Single lane-dense (Sp, H) store per grid step (all heads packed along lanes).
    o_ref[0, :, :] = jnp.concatenate(ctxs, axis=-1).astype(o_ref.dtype)


def entity_aware_attention(wq, eq, kv, *, word_len, ent_len, num_heads):
    B, Swp, twoH = wq.shape
    Sep = eq.shape[1]
    Sp = kv.shape[1]
    H = twoH // 2
    kernel = functools.partial(_ea_attn_kernel, word_len=word_len,
                               ent_len=ent_len, num_heads=num_heads)
    return pl.pallas_call(
        kernel,
        out_shape=jax.ShapeDtypeStruct((B, Sp, H), jnp.bfloat16),
        grid=(B,),
        in_specs=[
            pl.BlockSpec((1, Swp, twoH), lambda b: (b, 0, 0)),
            pl.BlockSpec((1, Sep, twoH), lambda b: (b, 0, 0)),
            pl.BlockSpec((1, Sp, twoH), lambda b: (b, 0, 0)),
        ],
        out_specs=pl.BlockSpec((1, Sp, H), lambda b: (b, 0, 0)),
        compiler_params=pltpu.CompilerParams(
            dimension_semantics=("parallel",),
            vmem_limit_bytes=32 * 1024 * 1024),
        cost_estimate=pl.CostEstimate(
            flops=4 * B * Sp * Sp * H,
            transcendentals=B * num_heads * Sp * Sp,
            bytes_accessed=2 * 5 * B * Sp * H),
    )(wq, eq, kv)


# ---------------------------------------------------------------------------
# Kernel 3: LukeSelfOutput  y = LayerNorm(ctx @ Wo.T + bo + residual)
# bf16 matmul operands, f32 residual / LayerNorm epilogue, f32 output.
# ---------------------------------------------------------------------------
def _output_kernel(x_ref, res_ref, w_ref, b_ref, g_ref, beta_ref, o_ref, *, eps):
    y = jax.lax.dot_general(
        x_ref[...], w_ref[...],
        dimension_numbers=(((1,), (1,)), ((), ())),
        preferred_element_type=jnp.float32)
    y = y + b_ref[...] + res_ref[...].astype(jnp.float32)
    mu = jnp.mean(y, axis=-1, keepdims=True)
    var = jnp.mean(jnp.square(y - mu), axis=-1, keepdims=True)
    yn = (y - mu) * jax.lax.rsqrt(var + eps)
    o_ref[...] = (yn * g_ref[...] + beta_ref[...]).astype(o_ref.dtype)


def output_dense_layernorm(x2d, res2d, w, b, gamma, beta, *, eps, tm=256):
    M, H = x2d.shape
    tm = min(tm, M)
    grid_m = pl.cdiv(M, tm)
    kernel = functools.partial(_output_kernel, eps=eps)
    return pl.pallas_call(
        kernel,
        out_shape=jax.ShapeDtypeStruct((M, H), jnp.float32),
        grid=(grid_m,),
        in_specs=[
            pl.BlockSpec((tm, H), lambda i: (i, 0)),   # context (bf16)
            pl.BlockSpec((tm, H), lambda i: (i, 0)),   # residual (f32)
            pl.BlockSpec((H, H), lambda i: (0, 0)),    # weight resident (bf16)
            pl.BlockSpec((1, H), lambda i: (0, 0)),
            pl.BlockSpec((1, H), lambda i: (0, 0)),
            pl.BlockSpec((1, H), lambda i: (0, 0)),
        ],
        out_specs=pl.BlockSpec((tm, H), lambda i: (i, 0)),
        compiler_params=pltpu.CompilerParams(
            dimension_semantics=("parallel",),
            vmem_limit_bytes=32 * 1024 * 1024),
        cost_estimate=pl.CostEstimate(
            flops=2 * M * H * H + 10 * M * H,
            transcendentals=M,
            bytes_accessed=2 * M * H + 4 * M * H + 2 * H * H + 4 * M * H + 12 * H),
    )(x2d, res2d, w,
      b.reshape(1, H).astype(jnp.float32),
      gamma.reshape(1, H).astype(jnp.float32),
      beta.reshape(1, H).astype(jnp.float32))


# ---------------------------------------------------------------------------
# Full LukeAttention forward (eval mode: dropout = identity).
# ---------------------------------------------------------------------------
def luke_attention(word_hidden_states, entity_hidden_states, params, *,
                   num_heads, eps, use_entity_aware_attention=True):
    # TODO(synk): attention_mask / head_mask / output_attentions and the
    # entity_hidden_states=None fallback are not implemented (eval path, unpadded batch).
    B, Sw, H = word_hidden_states.shape
    Se = entity_hidden_states.shape[1]
    dh = H // num_heads
    scale = 1.0 / math.sqrt(dh)

    SUB = 16                      # bf16 sublane tile: keep the word|entity split aligned
    Swp = _round_up(Sw, SUB)
    Sep = _round_up(Se, SUB)
    Sp = Swp + Sep

    # Pad once, cast activations to bf16 once (residual stays f32 for the LayerNorm).
    word_p = _pad_seq(word_hidden_states, Swp)
    ent_p = _pad_seq(entity_hidden_states, Sep)
    concat_f32 = jnp.concatenate([word_p, ent_p], axis=1)            # (B, Sp, H)
    concat_bf = concat_f32.astype(jnp.bfloat16)
    word_bf = word_p.astype(jnp.bfloat16)
    ent_bf = ent_p.astype(jnp.bfloat16)

    bf = lambda a: a.astype(jnp.bfloat16)

    # Fused projections: 7 nn.Linear layers -> 3 pallas_calls with stacked [2H, H] weights.
    w_kv = bf(jnp.concatenate([params["k_w"], params["v_w"]], axis=0))
    b_kv = jnp.concatenate([params["k_b"], params["v_b"]])
    kv = linear(concat_bf.reshape(B * Sp, H), w_kv, b_kv).reshape(B, Sp, 2 * H)

    if use_entity_aware_attention:
        # Fold 1/sqrt(dh) into the query-side weights & biases (free vs scaling scores).
        w_wq = bf(jnp.concatenate([params["q_w"], params["w2e_w"]], axis=0) * scale)
        b_wq = jnp.concatenate([params["q_b"], params["w2e_b"]]) * scale
        w_eq = bf(jnp.concatenate([params["e2w_w"], params["e2e_w"]], axis=0) * scale)
        b_eq = jnp.concatenate([params["e2w_b"], params["e2e_b"]]) * scale
    else:
        # Plain attention: the same query is scored against word and entity keys.
        w_q2 = bf(jnp.concatenate([params["q_w"], params["q_w"]], axis=0) * scale)
        b_q2 = jnp.concatenate([params["q_b"], params["q_b"]]) * scale
        w_wq, b_wq, w_eq, b_eq = w_q2, b_q2, w_q2, b_q2
    wq = linear(word_bf.reshape(B * Swp, H), w_wq, b_wq).reshape(B, Swp, 2 * H)
    eq = linear(ent_bf.reshape(B * Sep, H), w_eq, b_eq).reshape(B, Sep, 2 * H)

    ctx = entity_aware_attention(wq, eq, kv, word_len=Sw, ent_len=Se,
                                 num_heads=num_heads)                # (B, Sp, H) bf16

    out2d = output_dense_layernorm(
        ctx.reshape(B * Sp, H), concat_f32.reshape(B * Sp, H),
        bf(params["o_w"]), params["o_b"], params["ln_g"], params["ln_b"], eps=eps)
    out = out2d.reshape(B, Sp, H)
    return out[:, :Sw, :], out[:, Swp:Swp + Se, :]


# ---------------------------------------------------------------------------
# Pure-JAX f32 reference mirroring the PyTorch module (eval mode).
# ---------------------------------------------------------------------------
def _reference(word_hs, entity_hs, p, num_heads, eps):
    B, Sw, H = word_hs.shape
    dh = H // num_heads

    def lin(x, w, b):
        return x @ w.T + b

    def t4(x):
        b_, s_, _ = x.shape
        return x.reshape(b_, s_, num_heads, dh).transpose(0, 2, 1, 3)

    concat = jnp.concatenate([word_hs, entity_hs], axis=1)
    k = t4(lin(concat, p["k_w"], p["k_b"]))
    v = t4(lin(concat, p["v_w"], p["v_b"]))
    qw2w = t4(lin(word_hs, p["q_w"], p["q_b"]))
    qw2e = t4(lin(word_hs, p["w2e_w"], p["w2e_b"]))
    qe2w = t4(lin(entity_hs, p["e2w_w"], p["e2w_b"]))
    qe2e = t4(lin(entity_hs, p["e2e_w"], p["e2e_b"]))
    kw, ke = k[:, :, :Sw], k[:, :, Sw:]
    w2w = qw2w @ kw.transpose(0, 1, 3, 2)
    w2e = qw2e @ ke.transpose(0, 1, 3, 2)
    e2w = qe2w @ kw.transpose(0, 1, 3, 2)
    e2e = qe2e @ ke.transpose(0, 1, 3, 2)
    word_scores = jnp.concatenate([w2w, w2e], axis=3)
    ent_scores = jnp.concatenate([e2w, e2e], axis=3)
    scores = jnp.concatenate([word_scores, ent_scores], axis=2) / math.sqrt(dh)
    probs = jax.nn.softmax(scores, axis=-1)
    ctx = (probs @ v).transpose(0, 2, 1, 3).reshape(B, concat.shape[1], H)
    y = lin(ctx, p["o_w"], p["o_b"]) + concat
    mu = y.mean(-1, keepdims=True)
    var = jnp.square(y - mu).mean(-1, keepdims=True)
    y = (y - mu) / jnp.sqrt(var + eps) * p["ln_g"] + p["ln_b"]
    return y[:, :Sw], y[:, Sw:]


if __name__ == "__main__":
    key = jax.random.PRNGKey(0)
    B, Sw, Se, H, NH = 2, 8, 4, 32, 4
    eps = 1e-12

    keys = jax.random.split(key, 20)
    word = jax.random.normal(keys[0], (B, Sw, H), dtype=jnp.float32)
    ent = jax.random.normal(keys[1], (B, Se, H), dtype=jnp.float32)

    bound = 1.0 / math.sqrt(H)
    params = {}
    for i, name in enumerate(["q", "k", "v", "w2e", "e2w", "e2e", "o"]):
        kw_, kb_ = keys[2 + 2 * i], keys[3 + 2 * i]
        params[name + "_w"] = jax.random.uniform(
            kw_, (H, H), minval=-bound, maxval=bound, dtype=jnp.float32)
        params[name + "_b"] = jax.random.uniform(
            kb_, (H,), minval=-bound, maxval=bound, dtype=jnp.float32)
    params["ln_g"] = 1.0 + 0.1 * jax.random.normal(keys[16], (H,), dtype=jnp.float32)
    params["ln_b"] = 0.1 * jax.random.normal(keys[17], (H,), dtype=jnp.float32)

    word_out, ent_out = luke_attention(word, ent, params, num_heads=NH, eps=eps)
    word_out, ent_out = jax.block_until_ready((word_out, ent_out))

    ref_w, ref_e = _reference(word, ent, params, NH, eps)
    assert word_out.shape == (B, Sw, H) and ent_out.shape == (B, Se, H)
    # bf16 matmul operands (f32 accumulate) vs. an f32 reference -> loosened tolerance.
    assert jnp.allclose(word_out, ref_w, atol=5e-2, rtol=5e-2), "word output mismatch"
    assert jnp.allclose(ent_out, ref_e, atol=5e-2, rtol=5e-2), "entity output mismatch"
    print("KERNEL_OK")
</pallas_src>

<mosaic_0001>
module attributes {stable_mosaic.version = 11 : i64} {
  func.func @_linear_kernel(%arg0: i32, %arg1: memref<64x32xbf16, #tpu.memory_space<vmem>>, %arg2: memref<64x32xbf16, #tpu.memory_space<vmem>>, %arg3: memref<1x64xf32, #tpu.memory_space<vmem>>, %arg4: memref<64x64xbf16, #tpu.memory_space<vmem>>) attributes {dimension_semantics = [#tpu.dimension_semantics<parallel>], iteration_bounds = array<i64: 1>, scalar_prefetch = 0 : i64, scratch_operands = 0 : i64, tpu.core_type = #tpu.core_type<tc>, window_params = [{transform_indices = @transform_0, window_bounds = array<i64: 64, 32>}, {pipeline_mode = #tpu.pipeline_mode<synchronous>, transform_indices = @transform_1, window_bounds = array<i64: 64, 32>}, {pipeline_mode = #tpu.pipeline_mode<synchronous>, transform_indices = @transform_2, window_bounds = array<i64: 1, 64>}, {transform_indices = @transform_3, window_bounds = array<i64: 64, 64>}]} {
    %c0 = arith.constant 0 : index
    %c0_0 = arith.constant 0 : index
    %0 = vector.load %arg1[%c0, %c0_0] : memref<64x32xbf16, #tpu.memory_space<vmem>>, vector<64x32xbf16>
    %c0_1 = arith.constant 0 : index
    %c0_2 = arith.constant 0 : index
    %1 = vector.load %arg2[%c0_1, %c0_2] : memref<64x32xbf16, #tpu.memory_space<vmem>>, vector<64x32xbf16>
    %cst = arith.constant dense<0.000000e+00> : vector<64x64xf32>
    %2 = tpu.matmul %0, %1, %cst {dimension_numbers = #tpu.dot_dimension_numbers<[1], [1], [0], [0], [0, 0, 1, 0], [], []>} : vector<64x32xbf16>, vector<64x32xbf16>, vector<64x64xf32> -> vector<64x64xf32>
    %c0_3 = arith.constant 0 : index
    %c0_4 = arith.constant 0 : index
    %3 = vector.load %arg3[%c0_3, %c0_4] : memref<1x64xf32, #tpu.memory_space<vmem>>, vector<1x64xf32>
    %4 = vector.broadcast %3 : vector<1x64xf32> to vector<64x64xf32>
    %5 = arith.addf %2, %4 : vector<64x64xf32>
    %6 = arith.truncf %5 : vector<64x64xf32> to vector<64x64xbf16>
    %c0_5 = arith.constant 0 : index
    %c0_6 = arith.constant 0 : index
    %7 = vector.load %arg4[%c0_5, %c0_6] : memref<64x64xbf16, #tpu.memory_space<vmem>>, vector<64x64xbf16>
    tpu.vector_store %arg4[%c0_5, %c0_6], %6 {strides = array<i32>} : memref<64x64xbf16, #tpu.memory_space<vmem>>, vector<64x64xbf16>,
    return
  }
  func.func @transform_0(%arg0: i32) -> (i32, i32) {
    %c0_i32 = arith.constant 0 : i32
    %c0_i32_0 = arith.constant 0 : i32
    return %arg0, %c0_i32 : i32, i32
  }
  func.func @transform_1(%arg0: i32) -> (i32, i32) {
    %c0_i32 = arith.constant 0 : i32
    %c0_i32_0 = arith.constant 0 : i32
    %c0_i32_1 = arith.constant 0 : i32
    return %c0_i32, %c0_i32_0 : i32, i32
  }
  func.func @transform_2(%arg0: i32) -> (i32, i32) {
    %c0_i32 = arith.constant 0 : i32
    %c0_i32_0 = arith.constant 0 : i32
    %c0_i32_1 = arith.constant 0 : i32
    return %c0_i32, %c0_i32_0 : i32, i32
  }
  func.func @transform_3(%arg0: i32) -> (i32, i32) {
    %c0_i32 = arith.constant 0 : i32
    %c0_i32_0 = arith.constant 0 : i32
    return %arg0, %c0_i32 : i32, i32
  }
}

</mosaic_0001>

<bundles_post_ra>
// kernel: tpu_custom_call.1
= control target key start
LH: loop header
LB: loop body
LE: loop exit
PB: predicated region body
PF: predicated region fallthrough
CT: control target
= control target key end

     0   :  { %vm79_vm0 = vcmask 261120   ;;  %s416_s0 = inlined_call_operand.vmem [shape: bf16[64,32], index: 0, kind: input, shape index: {}]   ;;  %s417_s1 = inlined_call_operand.vmem [shape: bf16[64,32], index: 1, kind: input, shape index: {}]   ;;  %s418_s2 = inlined_call_operand.vmem [shape: f32[1,64], index: 2, kind: input, shape index: {}]   ;;  %s419_s3 = inlined_call_operand.hbm [shape: bf16[64,64], index: 3, kind: output, shape index: {}]  }
   0x1   :  { %v298_v0 = vld [vmem:[%s417_s1] sm:$0xff]   ;;  %v299_v1 = vld [vmem:[%s417_s1 + $0x8] sm:$0xff]   ;;  %v303_v4 = vld [vmem:[%s416_s0 + $0x10] sm:$0xff]  }
   0x2   :  { %287 = vmatprep.subr.msk.bf16.mxu0 %vm79_vm0, %v298_v0  ;;  %288 = vmatprep.subr.msk.bf16.mxu1 %vm79_vm0, %v298_v0  ;;  %v93_v2 = vsel %vm79_vm0, %v298_v0, 0  ;;  %v302_v3 = vld [vmem:[%s416_s0] sm:$0xff]   ;;  %v96_v5 = vsel %vm79_vm0, %v299_v1, 0  ;;  %v300_v6 = vld [vmem:[%s417_s1 + $0x10] sm:$0xff]  }
   0x3   :  { %264 = vmatpush3.bf16.xpose.msra.mxu0 %v93_v2  ;;  %283 = vmatpush3.bf16.xpose.msra.mxu1 %v93_v2 }
   0x4   :  { %289 = vmatprep.subr.msk.bf16.mxu0 %vm79_vm0, %v299_v1  ;;  %290 = vmatprep.subr.msk.bf16.mxu1 %vm79_vm0, %v299_v1 }
   0x5   :  { %271 = vmatprep.mubr.msk.bf16.mxu0 %vm79_vm0, %v302_v3  ;;  %275 = vmatprep.mubr.msk.bf16.mxu1 %vm79_vm0, %v303_v4 }
   0x6   :  { %8 = vsyncpa [#allocation3], 0  ;;  %v99_v7 = vsel %vm79_vm0, %v300_v6, 0  ;;  %v301_v8 = vld [vmem:[%s417_s1 + $0x18] sm:$0xff]   ;;  %v304_v10 = vld [vmem:[%s416_s0 + $0x8] sm:$0xff]   ;;  %vm201_vm1 = vcmask 519168  }
   0x7   :  { %v102_v9 = vsel %vm79_vm0, %v301_v8, 0  ;;  %v305_v11 = vld [vmem:[%s416_s0 + $0x18] sm:$0xff]   ;;  %v226_v12 = vld [vmem:[%s418_s2] ss:$0 sm:$0xff]  ;;  %s330_s0 = smov [#allocation2]  }
   0x8   :  { %s215_s29 = sshll.u32 %s330_s0, 4  ;;  %s216_s29 = int_to_ptr.vmem [resolvable:$true] %s215_s29 }
   0x9   :  { %s306_s2 = scalar_lea.vmem %s216_s29, 512  ;;  %p311_p1 = scmp.lt.s32.totalorder %s216_s29, %s216_s29 }
   0xa   :  { %p307_p0 = scmp.ne.s32.totalorder %s216_s29, %s306_s2  ;;  %p312_p2 = scmp.lt.s32.totalorder %s306_s2, %s306_s2 }
   0xb   :  { %266 = vmatpush3.bf16.xpose.msra.mxu0 %v96_v5  ;;  %284 = vmatpush3.bf16.xpose.msra.mxu1 %v96_v5 }
   0xc   :  { %291 = vmatprep.subr.msk.bf16.mxu0 %vm79_vm0, %v300_v6  ;;  %292 = vmatprep.subr.msk.bf16.mxu1 %vm79_vm0, %v300_v6  ;;  %p313_p3 = por %p312_p2, %p311_p1 }
   0xe   :  { %p314_p4 = pnand %p313_p3, %p307_p0 }
  0x13   :  { %268 = vmatpush3.bf16.xpose.msra.mxu0 %v99_v7  ;;  %285 = vmatpush3.bf16.xpose.msra.mxu1 %v99_v7 }
  0x14   :  { %293 = vmatprep.subr.msk.bf16.mxu0 %vm79_vm0, %v301_v8  ;;  %294 = vmatprep.subr.msk.bf16.mxu1 %vm79_vm0, %v301_v8 }
  0x1b   :  { %270 = vmatpush3.bf16.xpose.msra.mxu0 %v102_v9  ;;  %286 = vmatpush3.bf16.xpose.msra.mxu1 %v102_v9 }
  0x22   :  { %272 = vmatmul.mubr.msk.bf16.vlgmr.msra.gmra.mrb[0].mxu0 %vm79_vm0, %v304_v10  ;;  %276 = vmatmul.mubr.msk.bf16.vlgmr.msra.gmra.mrb[0].mxu1 %vm79_vm0, %v305_v11 }
  0xf5   :  { %v273_v13 = vpop.f32.mrb[0].mxu0  ;;  %v277_v14 = vpop.f32.mrb[0].mxu1 }
  0xf6   :  { %v147_v15 = vadd.f32 %v273_v13, %v226_v12  ;;  %v163_v16 = vadd.f32 %v277_v14, %v226_v12  ;;  %v138_v17 = vpop.f32.mrb[1].mxu0  ;;  %v154_v18 = vpop.f32.mrb[1].mxu1 }
  0xf7   :  { %v139_v19 = vadd.f32 %v226_v12, %v138_v17  ;;  %v155_v20 = vadd.f32 %v226_v12, %v154_v18  ;;  %v274_v21 = vpop.f32.mrb[2].mxu0  ;;  %v278_v22 = vpop.f32.mrb[2].mxu1 }
  0xf8   :  { %v249_v23 = vpack.c.bf16 %v147_v15, %v147_v15  ;;  %v253_v24 = vpack.c.bf16 %v163_v16, %v163_v16  ;;  %v150_v25 = vadd.f32 %v274_v21, %v226_v12  ;;  %v166_v26 = vadd.f32 %v278_v22, %v226_v12  ;;  %v141_v27 = vpop.f32.mrb[3].mxu0  ;;  %v157_v28 = vpop.f32.mrb[3].mxu1 }
  0xf9   :  { %v247_v29 = vpack.c.bf16 %v139_v19, %v139_v19  ;;  %v251_v30 = vpack.c.bf16 %v155_v20, %v155_v20  ;;  %v142_v31 = vadd.f32 %v226_v12, %v141_v27  ;;  %v158_v32 = vadd.f32 %v226_v12, %v157_v28 }
  0xfa   :  { %204 = vst.msk [vmem:[#allocation2 + $0x8] sm:$0xf] %vm201_vm1, %v249_v23  ;;  %208 = vst.msk [vmem:[#allocation2 + $0x18] sm:$0xf] %vm201_vm1, %v253_v24  ;;  %v250_v33 = vpack.c.bf16 %v150_v25, %v150_v25  ;;  %v254_v34 = vpack.c.bf16 %v166_v26, %v166_v26 }
  0xfb   :  { %202 = vst.msk [vmem:[#allocation2] sm:$0xf] %vm201_vm1, %v247_v29  ;;  %206 = vst.msk [vmem:[#allocation2 + $0x10] sm:$0xf] %vm201_vm1, %v251_v30  ;;  %v248_v35 = vpack.c.bf16 %v142_v31, %v142_v31  ;;  %v252_v36 = vpack.c.bf16 %v158_v32, %v158_v32 }
  0xfc   :  { %205 = vst.msk [vmem:[#allocation2 + $0xc] sm:$0xf] %vm201_vm1, %v250_v33  ;;  %209 = vst.msk [vmem:[#allocation2 + $0x1c] sm:$0xf] %vm201_vm1, %v254_v34 }
  0xfd   :  { %203 = vst.msk [vmem:[#allocation2 + $0x4] sm:$0xf] %vm201_vm1, %v248_v35  ;;  %207 = vst.msk [vmem:[#allocation2 + $0x14] sm:$0xf] %vm201_vm1, %v252_v36 }
  0xfe   :  { %317 = shalt.err (!%p314_p4)
}
  0xff   :  { %s318_s5 = scalar_lea.hbm %s419_s3, 512 }
 0x100   :  { %p319_p5 = scmp.ne.s32.totalorder %s419_s3, %s318_s5  ;;  %p322_p6 = scmp.lt.u32.totalorder %s318_s5, %s419_s3 }
 0x102   :  { %p324_p7 = pnand %p322_p6, %p319_p5 }
 0x104   :  { %327 = shalt.err (!%p324_p7)
}
 0x105   :  { %s331_s10 = smov 64   ;;  %s332_s11 = smov 4  }
 0x106   :  { %221 = dma.vmem_to_hbm [thread:$0]  %s216_s29, 512, %s419_s3, [#allocation3], %s331_s10, %s331_s10, %s332_s11  }
 0x107   :  { %328 = dma.done.wait [#allocation3], 512  }
 0x108   :  { %329 = vsyncadd [#allocation3], 4294966784 }
 0x109   :  { %225 = vsyncpa [#allocation3], 1 }

</bundles_post_ra>
